<compile_context>
chip_gen: v7x
topology: tpu7x:2x2x1
jax: 0.10.0
libtpu: 0.0.40
codegen_flags: <defaults>
</compile_context>

<pallas_src>
import jax
import jax.numpy as jnp
from jax.experimental import pallas as pl
from jax.experimental.pallas import tpu as pltpu


def _round_up(n, m):
    return ((n + m - 1) // m) * m


# ----------------------------------------------------------------------------
# Pallas kernel: 3x (matmul + bias [+ ReLU]).  BN is pre-folded into W/b.
# One grid axis over batch tiles; weights/biases are resident full-array blocks.
# ----------------------------------------------------------------------------
def _mlp_kernel(x_ref, w1_ref, w2_ref, w3_ref, b1_ref, b2_ref, b3_ref, o_ref):
    # Layer 1: bf16 MXU inputs, f32 accumulation.
    h = jnp.dot(x_ref[...], w1_ref[...], preferred_element_type=jnp.float32)
    h = jnp.maximum(h + b1_ref[...], 0.0).astype(jnp.bfloat16)
    # Layer 2.
    h = jnp.dot(h, w2_ref[...], preferred_element_type=jnp.float32)
    h = jnp.maximum(h + b2_ref[...], 0.0).astype(jnp.bfloat16)
    # Layer 3 (no activation); store the true-width f32 output block.
    o_ref[...] = (jnp.dot(h, w3_ref[...], preferred_element_type=jnp.float32)
                  + b3_ref[...])


def mlp_forward(x, folded_params, num_targets, *, block_b=2048):
    """Run the fused MLP forward. x: (B, num_features) float32."""
    w1, w2, w3, b1, b2, b3 = folded_params
    B, F = x.shape
    H = w1.shape[1]
    OUT = w3.shape[1]
    assert OUT == num_targets

    # --- batch tiling: derive tb from the tile count so padding stays small ---
    n_tiles = pl.cdiv(B, block_b)
    # v7x megacore: keep an even number of tiles when there is enough work so
    # the "parallel" batch axis shards across both TensorCores.
    if B >= 1024 and n_tiles % 2 == 1:
        n_tiles += 1
    tb = _round_up(pl.cdiv(B, n_tiles), 8)          # sublane-aligned tile
    b_pad = n_tiles * tb                            # padding bounded (<~8*n_tiles rows)

    xb = x.astype(jnp.bfloat16)
    if b_pad != B:
        xb = jnp.pad(xb, ((0, b_pad - B), (0, 0)))

    flops = 2 * b_pad * (F * H + H * H + H * OUT)
    bytes_accessed = (b_pad * F * 2                       # x read (bf16)
                      + (F * H + H * H + H * OUT) * 2     # weights (bf16)
                      + (2 * H + OUT) * 4                 # biases (f32)
                      + b_pad * OUT * 4)                  # output write (f32, unpadded)

    # Explicit scoped-VMEM cap (tiny at these shapes; headroom factor 2).
    vmem_est = (2 * 2 * (F * H + H * H + H * OUT)         # bf16 weights, 2-deep bufs
                + 2 * 4 * (2 * H + OUT)                   # f32 biases, 2-deep bufs
                + 2 * (tb * F * 2 + tb * OUT * 4)         # double-buffered x / out
                + 4 * tb * H * 4)                         # f32 intermediates headroom
    vmem_limit = int(min(max(4 * 1024 * 1024, 2 * vmem_est), 64 * 1024 * 1024))

    out = pl.pallas_call(
        _mlp_kernel,
        out_shape=jax.ShapeDtypeStruct((b_pad, OUT), jnp.float32),
        grid_spec=pltpu.PrefetchScalarGridSpec(
            num_scalar_prefetch=0,
            grid=(n_tiles,),
            in_specs=[
                pl.BlockSpec((tb, F), lambda i: (i, 0)),    # x tile (pipelined)
                pl.BlockSpec((F, H), lambda i: (0, 0)),     # w1 (resident)
                pl.BlockSpec((H, H), lambda i: (0, 0)),     # w2 (resident)
                pl.BlockSpec((H, OUT), lambda i: (0, 0)),   # w3 (resident, unpadded)
                pl.BlockSpec((1, H), lambda i: (0, 0)),     # b1
                pl.BlockSpec((1, H), lambda i: (0, 0)),     # b2
                pl.BlockSpec((1, OUT), lambda i: (0, 0)),   # b3
            ],
            out_specs=pl.BlockSpec((tb, OUT), lambda i: (i, 0)),
        ),
        compiler_params=pltpu.CompilerParams(
            dimension_semantics=("parallel",),
            vmem_limit_bytes=vmem_limit),
        cost_estimate=pl.CostEstimate(flops=flops, transcendentals=0,
                                      bytes_accessed=bytes_accessed),
    )(xb, w1, w2, w3, b1, b2, b3)

    return out[:B]


# ----------------------------------------------------------------------------
# Parameter construction (host-side glue, deterministic).
# ----------------------------------------------------------------------------
def _weight_norm(v, g):
    # PyTorch nn.utils.weight_norm(Linear) with default dim=0:
    #   W[i, :] = g[i] * v[i, :] / ||v[i, :]||
    norm = jnp.sqrt(jnp.sum(v * v, axis=1, keepdims=True))
    return g * v / norm


def _fold_bn(gamma, beta, mean, var, eps=1e-5):
    scale = gamma / jnp.sqrt(var + eps)
    shift = beta - mean * scale
    return scale, shift          # (C,), (C,)


def make_params(key, num_features, num_targets, hidden_size):
    """Returns (raw_params_dict (f32), folded_kernel_operands (bf16 W, f32 b))."""
    keys = jax.random.split(key, 15)

    def linear(kv, kg, kb, fan_in, fan_out):
        bound = 1.0 / (fan_in ** 0.5)
        v = jax.random.uniform(kv, (fan_out, fan_in), jnp.float32, -bound, bound)
        g = jax.random.uniform(kg, (fan_out, 1), jnp.float32, 0.5, 1.5)
        b = jax.random.uniform(kb, (fan_out,), jnp.float32, -bound, bound)
        w = _weight_norm(v, g)                     # (out, in)
        return w.T, b                              # (in, out), (out,)

    def bn(kg, kb, c):
        gamma = jax.random.uniform(kg, (c,), jnp.float32, 0.5, 1.5)
        beta = jax.random.uniform(kb, (c,), jnp.float32, -0.5, 0.5)
        mean = jnp.zeros((c,), jnp.float32)        # fresh running stats (eval mode)
        var = jnp.ones((c,), jnp.float32)
        return _fold_bn(gamma, beta, mean, var)

    s1, t1 = bn(keys[0], keys[1], num_features)
    w1, b1 = linear(keys[2], keys[3], keys[4], num_features, hidden_size)
    s2, t2 = bn(keys[5], keys[6], hidden_size)
    w2, b2 = linear(keys[7], keys[8], keys[9], hidden_size, hidden_size)
    s3, t3 = bn(keys[10], keys[11], hidden_size)
    w3, b3 = linear(keys[12], keys[13], keys[14], hidden_size, num_targets)

    raw = dict(s1=s1, t1=t1, w1=w1, b1=b1,
               s2=s2, t2=t2, w2=w2, b2=b2,
               s3=s3, t3=t3, w3=w3, b3=b3)

    # ---- fold BN affine into the matmuls (host-side, once); bf16 weights ----
    w1f = (w1 * s1[:, None]).astype(jnp.bfloat16)
    b1f = (t1 @ w1 + b1).reshape(1, -1)            # f32 (1, H)
    w2f = (w2 * s2[:, None]).astype(jnp.bfloat16)
    b2f = (t2 @ w2 + b2).reshape(1, -1)            # f32 (1, H)
    w3f = (w3 * s3[:, None]).astype(jnp.bfloat16)
    b3f = (t3 @ w3 + b3).reshape(1, -1)            # f32 (1, num_targets)

    folded = (w1f, w2f, w3f, b1f, b2f, b3f)
    return raw, folded


def reference_forward(x, raw):
    """Pure-JAX f32 reference of the PyTorch module in eval mode (unfolded params)."""
    h = x * raw["s1"] + raw["t1"]
    h = jnp.maximum(h @ raw["w1"] + raw["b1"], 0.0)
    h = h * raw["s2"] + raw["t2"]
    h = jnp.maximum(h @ raw["w2"] + raw["b2"], 0.0)
    h = h * raw["s3"] + raw["t3"]
    return h @ raw["w3"] + raw["b3"]


if __name__ == "__main__":
    batch = 8
    num_features = 32
    hidden_size = 32
    num_targets = 8

    key = jax.random.PRNGKey(0)
    kx, kp = jax.random.split(key)
    x = jax.random.normal(kx, (batch, num_features), jnp.float32)
    raw, folded = make_params(kp, num_features, num_targets, hidden_size)

    out = mlp_forward(x, folded, num_targets)
    out = jax.block_until_ready(out)

    ref = reference_forward(x, raw)
    assert out.shape == (batch, num_targets)
    # bf16 weights/activations vs. f32 reference -> relaxed tolerance.
    assert jnp.allclose(out, ref, atol=5e-2, rtol=5e-2), "mismatch vs JAX reference"

    print("KERNEL_OK")
</pallas_src>

<mosaic_0001>
module attributes {stable_mosaic.version = 11 : i64} {
  func.func @_mlp_kernel(%arg0: i32, %arg1: memref<8x32xbf16, #tpu.memory_space<vmem>>, %arg2: memref<32x32xbf16, #tpu.memory_space<vmem>>, %arg3: memref<32x32xbf16, #tpu.memory_space<vmem>>, %arg4: memref<32x8xbf16, #tpu.memory_space<vmem>>, %arg5: memref<1x32xf32, #tpu.memory_space<vmem>>, %arg6: memref<1x32xf32, #tpu.memory_space<vmem>>, %arg7: memref<1x8xf32, #tpu.memory_space<vmem>>, %arg8: memref<8x8xf32, #tpu.memory_space<vmem>>) attributes {dimension_semantics = [#tpu.dimension_semantics<parallel>], iteration_bounds = array<i64: 1>, scalar_prefetch = 0 : i64, scratch_operands = 0 : i64, tpu.core_type = #tpu.core_type<tc>, window_params = [{transform_indices = @transform_0, window_bounds = array<i64: 8, 32>}, {pipeline_mode = #tpu.pipeline_mode<synchronous>, transform_indices = @transform_1, window_bounds = array<i64: 32, 32>}, {pipeline_mode = #tpu.pipeline_mode<synchronous>, transform_indices = @transform_2, window_bounds = array<i64: 32, 32>}, {pipeline_mode = #tpu.pipeline_mode<synchronous>, transform_indices = @transform_3, window_bounds = array<i64: 32, 8>}, {pipeline_mode = #tpu.pipeline_mode<synchronous>, transform_indices = @transform_4, window_bounds = array<i64: 1, 32>}, {pipeline_mode = #tpu.pipeline_mode<synchronous>, transform_indices = @transform_5, window_bounds = array<i64: 1, 32>}, {pipeline_mode = #tpu.pipeline_mode<synchronous>, transform_indices = @transform_6, window_bounds = array<i64: 1, 8>}, {transform_indices = @transform_7, window_bounds = array<i64: 8, 8>}]} {
    %c0 = arith.constant 0 : index
    %c0_0 = arith.constant 0 : index
    %0 = vector.load %arg1[%c0, %c0_0] : memref<8x32xbf16, #tpu.memory_space<vmem>>, vector<8x32xbf16>
    %c0_1 = arith.constant 0 : index
    %c0_2 = arith.constant 0 : index
    %1 = vector.load %arg2[%c0_1, %c0_2] : memref<32x32xbf16, #tpu.memory_space<vmem>>, vector<32x32xbf16>
    %cst = arith.constant dense<0.000000e+00> : vector<8x32xf32>
    %2 = tpu.matmul %0, %1, %cst {dimension_numbers = #tpu.dot_dimension_numbers<[1], [0], [0], [1], [0, 0, 1, 1], [], []>} : vector<8x32xbf16>, vector<32x32xbf16>, vector<8x32xf32> -> vector<8x32xf32>
    %c0_3 = arith.constant 0 : index
    %c0_4 = arith.constant 0 : index
    %3 = vector.load %arg5[%c0_3, %c0_4] : memref<1x32xf32, #tpu.memory_space<vmem>>, vector<1x32xf32>
    %4 = vector.broadcast %3 : vector<1x32xf32> to vector<8x32xf32>
    %5 = arith.addf %2, %4 : vector<8x32xf32>
    %cst_5 = arith.constant 0.000000e+00 : f32
    %6 = vector.broadcast %cst_5 : f32 to vector<8x32xf32>
    %7 = arith.maximumf %5, %6 : vector<8x32xf32>
    %8 = arith.truncf %7 : vector<8x32xf32> to vector<8x32xbf16>
    %c0_6 = arith.constant 0 : index
    %c0_7 = arith.constant 0 : index
    %9 = vector.load %arg3[%c0_6, %c0_7] : memref<32x32xbf16, #tpu.memory_space<vmem>>, vector<32x32xbf16>
    %cst_8 = arith.constant dense<0.000000e+00> : vector<8x32xf32>
    %10 = tpu.matmul %8, %9, %cst_8 {dimension_numbers = #tpu.dot_dimension_numbers<[1], [0], [0], [1], [0, 0, 1, 1], [], []>} : vector<8x32xbf16>, vector<32x32xbf16>, vector<8x32xf32> -> vector<8x32xf32>
    %c0_9 = arith.constant 0 : index
    %c0_10 = arith.constant 0 : index
    %11 = vector.load %arg6[%c0_9, %c0_10] : memref<1x32xf32, #tpu.memory_space<vmem>>, vector<1x32xf32>
    %12 = vector.broadcast %11 : vector<1x32xf32> to vector<8x32xf32>
    %13 = arith.addf %10, %12 : vector<8x32xf32>
    %cst_11 = arith.constant 0.000000e+00 : f32
    %14 = vector.broadcast %cst_11 : f32 to vector<8x32xf32>
    %15 = arith.maximumf %13, %14 : vector<8x32xf32>
    %16 = arith.truncf %15 : vector<8x32xf32> to vector<8x32xbf16>
    %c0_12 = arith.constant 0 : index
    %c0_13 = arith.constant 0 : index
    %17 = vector.load %arg4[%c0_12, %c0_13] : memref<32x8xbf16, #tpu.memory_space<vmem>>, vector<32x8xbf16>
    %cst_14 = arith.constant dense<0.000000e+00> : vector<8x8xf32>
    %18 = tpu.matmul %16, %17, %cst_14 {dimension_numbers = #tpu.dot_dimension_numbers<[1], [0], [0], [1], [0, 0, 1, 1], [], []>} : vector<8x32xbf16>, vector<32x8xbf16>, vector<8x8xf32> -> vector<8x8xf32>
    %c0_15 = arith.constant 0 : index
    %c0_16 = arith.constant 0 : index
    %19 = vector.load %arg7[%c0_15, %c0_16] : memref<1x8xf32, #tpu.memory_space<vmem>>, vector<1x8xf32>
    %20 = vector.broadcast %19 : vector<1x8xf32> to vector<8x8xf32>
    %21 = arith.addf %18, %20 : vector<8x8xf32>
    %c0_17 = arith.constant 0 : index
    %c0_18 = arith.constant 0 : index
    %22 = vector.load %arg8[%c0_17, %c0_18] : memref<8x8xf32, #tpu.memory_space<vmem>>, vector<8x8xf32>
    tpu.vector_store %arg8[%c0_17, %c0_18], %21 {strides = array<i32>} : memref<8x8xf32, #tpu.memory_space<vmem>>, vector<8x8xf32>,
    return
  }
  func.func @transform_0(%arg0: i32) -> (i32, i32) {
    %c0_i32 = arith.constant 0 : i32
    %c0_i32_0 = arith.constant 0 : i32
    return %arg0, %c0_i32 : i32, i32
  }
  func.func @transform_1(%arg0: i32) -> (i32, i32) {
    %c0_i32 = arith.constant 0 : i32
    %c0_i32_0 = arith.constant 0 : i32
    %c0_i32_1 = arith.constant 0 : i32
    return %c0_i32, %c0_i32_0 : i32, i32
  }
  func.func @transform_2(%arg0: i32) -> (i32, i32) {
    %c0_i32 = arith.constant 0 : i32
    %c0_i32_0 = arith.constant 0 : i32
    %c0_i32_1 = arith.constant 0 : i32
    return %c0_i32, %c0_i32_0 : i32, i32
  }
  func.func @transform_3(%arg0: i32) -> (i32, i32) {
    %c0_i32 = arith.constant 0 : i32
    %c0_i32_0 = arith.constant 0 : i32
    %c0_i32_1 = arith.constant 0 : i32
    return %c0_i32, %c0_i32_0 : i32, i32
  }
  func.func @transform_4(%arg0: i32) -> (i32, i32) {
    %c0_i32 = arith.constant 0 : i32
    %c0_i32_0 = arith.constant 0 : i32
    %c0_i32_1 = arith.constant 0 : i32
    return %c0_i32, %c0_i32_0 : i32, i32
  }
  func.func @transform_5(%arg0: i32) -> (i32, i32) {
    %c0_i32 = arith.constant 0 : i32
    %c0_i32_0 = arith.constant 0 : i32
    %c0_i32_1 = arith.constant 0 : i32
    return %c0_i32, %c0_i32_0 : i32, i32
  }
  func.func @transform_6(%arg0: i32) -> (i32, i32) {
    %c0_i32 = arith.constant 0 : i32
    %c0_i32_0 = arith.constant 0 : i32
    %c0_i32_1 = arith.constant 0 : i32
    return %c0_i32, %c0_i32_0 : i32, i32
  }
  func.func @transform_7(%arg0: i32) -> (i32, i32) {
    %c0_i32 = arith.constant 0 : i32
    %c0_i32_0 = arith.constant 0 : i32
    return %arg0, %c0_i32 : i32, i32
  }
}

</mosaic_0001>

<bundles_post_ra>
// kernel: tpu_custom_call.1
= control target key start
LH: loop header
LB: loop body
LE: loop exit
PB: predicated region body
PF: predicated region fallthrough
CT: control target
= control target key end

     0   :  { %12 = vsyncpa [#allocation3], 0  ;;  %s465_s0 = inlined_call_operand.vmem [shape: bf16[8,32], index: 0, kind: input, shape index: {}]   ;;  %s466_s1 = inlined_call_operand.vmem [shape: bf16[32,32], index: 1, kind: input, shape index: {}]   ;;  %s467_s2 = inlined_call_operand.hbm [shape: bf16[32,32], index: 2, kind: input, shape index: {}]   ;;  %s468_s3 = inlined_call_operand.vmem [shape: bf16[32,8], index: 3, kind: input, shape index: {}]   ;;  %s469_s4 = inlined_call_operand.vmem [shape: f32[1,32], index: 4, kind: input, shape index: {}]   ;;  %s470_s5 = inlined_call_operand.vmem [shape: f32[1,32], index: 5, kind: input, shape index: {}]   ;;  %s471_s6 = inlined_call_operand.vmem [shape: f32[1,8], index: 6, kind: input, shape index: {}]   ;;  %s472_s7 = inlined_call_operand.hbm [shape: f32[8,8], index: 7, kind: output, shape index: {}]  }
   0x1   :  { %13 = vsyncpa [#allocation4], 0  ;;  %s368_s24 = smov [#allocation2]   ;;  %s320_s28 = scalar_lea.hbm %s467_s2, 256 }
   0x2   :  { %s23_s25 = sshll.u32 %s368_s24, 4  ;;  %p321_p0 = scmp.ne.s32.totalorder %s467_s2, %s320_s28  ;;  %s24_s25 = int_to_ptr.vmem [resolvable:$true] %s23_s25 }
   0x3   :  { %p324_p1 = scmp.lt.u32.totalorder %s320_s28, %s467_s2 }
   0x5   :  { %p326_p2 = pnand %p324_p1, %p321_p0 }
   0x7   :  { %329 = shalt.err (!%p326_p2)
}
   0x8   :  { %s330_s10 = scalar_lea.vmem %s24_s25, 256  ;;  %p335_p4 = scmp.lt.s32.totalorder %s24_s25, %s24_s25 }
   0x9   :  { %p331_p3 = scmp.ne.s32.totalorder %s24_s25, %s330_s10  ;;  %p336_p5 = scmp.lt.s32.totalorder %s330_s10, %s330_s10 }
   0xb   :  { %p337_p6 = por %p336_p5, %p335_p4 }
   0xd   :  { %p338_p7 = pnand %p337_p6, %p331_p3 }
   0xf   :  { %341 = shalt.err (!%p338_p7)
}
  0x10   :  { %s369_s11 = smov 64   ;;  %s370_s12 = smov 4  }
  0x11   :  { %29 = dma.hbm_to_vmem [thread:$0]  %s467_s2, 256, %s24_s25, [#allocation3], %s369_s11, %s369_s11, %s370_s12  }
  0x12   :  { %364 = dma.done.wait [#allocation3], 256  }
  0x13   :  { %365 = vsyncadd [#allocation3], 4294967040  ;;  %v371_v0 = vmov 0.0   ;;  %vm372_vm0 = vmmov 0   ;;  %v314_v1 = vld [vmem:[%s466_s1] sm:$0xff]   ;;  %v315_v2 = vld [vmem:[%s466_s1 + $0x8] sm:$0xff]  }
  0x14   :  { %284 = vmatprep.subr.bf16.mxu0 %v371_v0  ;;  %288 = vmatprep.mubr.msk.bf16.mxu0 %vm372_vm0, %v371_v0  ;;  %v42_v3 = vld [vmem:[%s465_s0] sm:$0xf]  ;;  %vm66_vm1 = vcmask 261120   ;;  %v317_v5 = vld [vmem:[#allocation2 + $0x8] sm:$0xff]   ;;  %s373_s27 = smov [#allocation5]   ;;  %vm246_vm2 = vcmask 64512  }
  0x15   :  { %292 = vmatprep.subr.bf16.mxu1 %v371_v0  ;;  %296 = vmatprep.mubr.msk.bf16.mxu1 %vm372_vm0, %v371_v0  ;;  %v316_v4 = vld [vmem:[#allocation2] sm:$0xff]   ;;  %v319_v15 = vld [vmem:[%s468_s3 + $0x8] sm:$0xff]  }
  0x16   :  { %285 = vmatpush3.bf16.msra.mxu0 %v314_v1  ;;  %293 = vmatpush3.bf16.msra.mxu1 %v316_v4  ;;  %v318_v6 = vld [vmem:[%s468_s3] sm:$0xff]   ;;  %s254_s3 = sshll.u32 %s373_s27, 4  ;;  %s255_s3 = int_to_ptr.vmem [resolvable:$true] %s254_s3 }
  0x17   :  { %286 = vmatprep.subr.bf16.mxu0 %v371_v0  ;;  %294 = vmatprep.subr.bf16.mxu1 %v371_v0  ;;  %v263_v7 = vld [vmem:[%s469_s4] ss:$0 sm:$0xff]  ;;  %p347_p9 = scmp.lt.s32.totalorder %s255_s3, %s255_s3 }
  0x18   :  { %v267_v16 = vld [vmem:[%s470_s5] ss:$0 sm:$0xff]  ;;  %s342_s5 = scalar_lea.vmem %s255_s3, 128 }
  0x19   :  { %v271_v24 = vld [vmem:[%s471_s6] ss:$0 sm:$0xff]  ;;  %p343_p8 = scmp.ne.s32.totalorder %s255_s3, %s342_s5  ;;  %p348_p10 = scmp.lt.s32.totalorder %s342_s5, %s342_s5 }
  0x1a   :  { %287 = vmatpush3.bf16.msra.mxu0 %v315_v2  ;;  %295 = vmatpush3.bf16.msra.mxu1 %v317_v5 }
  0x1b   :  { %300 = vmatprep.subr.bf16.mxu0 %v371_v0  ;;  %p349_p11 = por %p348_p10, %p347_p9 }
  0x1d   :  { %289 = vmatmul.mubr.msk.bf16.vlgmr.msra.gmra.mrb[0].mxu0 %vm66_vm1, %v42_v3  ;;  %p350_p12 = pnand %p349_p11, %p343_p8 }
  0x1e   :  { %304 = vmatprep.mubr.msk.bf16.mxu0 %vm372_vm0, %v371_v0  ;;  %301 = vmatpush3.bf16.msra.mxu0 %v318_v6 }
  0x1f   :  { %302 = vmatprep.subr.bf16.mxu0 %v371_v0 }
  0x22   :  { %303 = vmatpush3.bf16.msra.mxu0 %v319_v15 }
  0xf0   :  { %v104_v8 = vpop.f32.mrb[0].mxu0 }
  0xf1   :  { %v105_v9 = vadd.f32 %v263_v7, %v104_v8  ;;  %v290_v10 = vpop.f32.mrb[1].mxu0 }
  0xf2   :  { %v107_v11 = vpop.f32.mrb[2].mxu0 }
  0xf3   :  { %v110_v12 = vmax.f32 %v105_v9, 0.0  ;;  %v291_v13 = vpop.f32.mrb[3].mxu0 }
  0xf5   :  { %v111_v14 = vpack.c.bf16 %v110_v12, %v110_v12 }
  0xf7   :  { %297 = vmatmul.mubr.msk.bf16.vlgmr.msra.gmra.mrb[0].mxu1 %vm66_vm1, %v111_v14 }
 0x1ca   :  { %v172_v17 = vpop.f32.mrb[0].mxu1 }
 0x1cb   :  { %v173_v18 = vadd.f32 %v267_v16, %v172_v17  ;;  %v298_v19 = vpop.f32.mrb[1].mxu1 }
 0x1cc   :  { %v175_v20 = vpop.f32.mrb[2].mxu1 }
 0x1cd   :  { %v178_v21 = vmax.f32 %v173_v18, 0.0  ;;  %v299_v22 = vpop.f32.mrb[3].mxu1 }
 0x1cf   :  { %v179_v23 = vpack.c.bf16 %v178_v21, %v178_v21 }
 0x1d1   :  { %305 = vmatmul.mubr.msk.bf16.vlgmr.msra.gmra.mrb[4].mxu0 %vm66_vm1, %v179_v23 }
 0x2a4   :  { %v240_v25 = vpop.f32.mrb[4].mxu0 }
 0x2a5   :  { %v241_v26 = vadd.f32 %v271_v24, %v240_v25  ;;  %v306_v27 = vpop.f32.mrb[5].mxu0 }
 0x2a6   :  { %v243_v28 = vpop.f32.mrb[6].mxu0 }
 0x2a7   :  { %v307_v29 = vpop.f32.mrb[7].mxu0  ;;  %247 = vst.msk [vmem:[#allocation5] sm:$0xff] %vm246_vm2, %v241_v26 }
 0x2a8   :  { %353 = shalt.err (!%p350_p12)
}
 0x2a9   :  { %s354_s6 = scalar_lea.hbm %s472_s7, 128 }
 0x2aa   :  { %p355_p13 = scmp.ne.s32.totalorder %s472_s7, %s354_s6  ;;  %p358_p0 = scmp.lt.u32.totalorder %s354_s6, %s472_s7 }
 0x2ac   :  { %p360_p1 = pnand %p358_p0, %p355_p13 }
 0x2ae   :  { %363 = shalt.err (!%p360_p1)
}
 0x2af   :  { %257 = dma.vmem_to_hbm [thread:$0]  %s255_s3, 128, %s472_s7, [#allocation4]  }
 0x2b0   :  { %366 = dma.done.wait [#allocation4], 128  }
 0x2b1   :  { %367 = vsyncadd [#allocation4], 4294967168 }
 0x2b2   :  { %261 = vsyncpa [#allocation3], 1 }
 0x2b3   :  { %262 = vsyncpa [#allocation4], 1 }

</bundles_post_ra>
